<compile_context>
chip_gen: v7x
topology: tpu7x:2x2x1
jax: 0.10.0
libtpu: 0.0.40
codegen_flags: <defaults>
</compile_context>

<pallas_src>
import math

import jax
import jax.numpy as jnp
from jax.experimental import pallas as pl
from jax.experimental.pallas import tpu as pltpu


def _logit_adjust_kernel(x_ref, prior_ref, o_ref):
    # (TB, TC) logits tile + (1, TC) per-class log-prior row (sublane-broadcast add).
    # The add promotes to the wider dtype (e.g. bf16 + f32 -> f32) before the final cast,
    # matching PyTorch's type promotion for the f32 registered buffer.
    o_ref[...] = (x_ref[...] + prior_ref[...]).astype(o_ref.dtype)


def _lane_dense_width(batch, classes, max_width=2048):
    """Return L (a multiple of both 128 and `classes`) enabling a free lane-dense reshape,
    or None if the plain 2-D tiling should be used."""
    if classes % 128 == 0:
        return None
    l = classes * 128 // math.gcd(classes, 128)  # lcm(classes, 128)
    if l > max_width:
        return None
    reps = l // classes
    if batch % reps != 0:
        return None
    return l


def _broadcast_add_2d(x, prior_row, out_dtype):
    """out[r, c] = x[r, c] + prior_row[0, c] via a tiled Pallas kernel (no padding / slicing)."""
    rows, cols = x.shape
    x_bytes = jnp.dtype(x.dtype).itemsize
    out_bytes = jnp.dtype(out_dtype).itemsize
    prior_bytes = jnp.dtype(prior_row.dtype).itemsize

    # ---- Tile selection ---------------------------------------------------
    # ~2 MiB per logits tile => ~8 MiB double-buffered (input + output tiles), safe under
    # v5e's 16 MiB scoped-VMEM default and comfortably fine on v6e/v7x.  (A 4 MiB tile
    # amortizes per-step overhead slightly better on v7x; 2 MiB is the portable choice.)
    tc_max = 2048 if x_bytes <= 2 else 1024
    tb_max = 512
    # Block dims must be (8,128)-divisible OR equal to the full array dim; the grid may be
    # ragged (Pallas masks the edge blocks), so no wrapper-side padding is needed.
    tc = cols if cols <= tc_max else tc_max
    tb = rows if rows <= tb_max else tb_max
    n_c = pl.cdiv(cols, tc)
    n_b = pl.cdiv(rows, tb)

    extra = {}
    if x.dtype == out_dtype:
        # Lets XLA reuse/donate the logits buffer when the caller discards it.
        extra["input_output_aliases"] = {0: 0}

    return pl.pallas_call(
        _logit_adjust_kernel,
        out_shape=jax.ShapeDtypeStruct((rows, cols), out_dtype),
        grid_spec=pl.GridSpec(
            # Class tiles outer, batch tiles inner: the (1, tc) prior block index is constant
            # across consecutive inner steps, so Pallas skips re-fetching it.
            grid=(n_c, n_b),
            in_specs=[
                pl.BlockSpec((tb, tc), lambda j, i: (i, j)),   # logits tile
                pl.BlockSpec((1, tc), lambda j, i: (0, j)),    # per-class log-prior row
            ],
            out_specs=pl.BlockSpec((tb, tc), lambda j, i: (i, j)),
        ),
        compiler_params=pltpu.CompilerParams(
            # Elementwise op: every grid point is independent; "parallel" lets v7x shard
            # iterations across its 2 TensorCores (neutral on v5e/v6e).
            dimension_semantics=("parallel", "parallel"),
        ),
        cost_estimate=pl.CostEstimate(
            flops=rows * cols,
            transcendentals=0,
            bytes_accessed=rows * cols * (x_bytes + out_bytes) + cols * prior_bytes,
        ),
        **extra,
    )(x, prior_row)


def logit_adjust(logits: jax.Array, base_probs_log: jax.Array, *, training: bool = True) -> jax.Array:
    """Pallas implementation of LogitAdjust.forward.

    logits:          (B, C) array
    base_probs_log:  (C,)   array — the registered buffer log(class_counts / sum(class_counts))
    """
    if not training:
        # Eval path is a pure identity in the reference module.
        return logits

    B, C = logits.shape
    # Keep the log-prior in its own (f32) dtype inside the kernel; promote like PyTorch.
    out_dtype = jnp.result_type(logits.dtype, base_probs_log.dtype)
    prior_row = base_probs_log.reshape(1, C)

    # Narrow / non-128-multiple class axes: present a lane-dense view via a free row-major
    # reshape (B, C) -> (B*C/L, L) and tile the prior to L lanes, so stores are full
    # unmasked `vst` instead of sub-128 masked partial stores.
    lane_width = _lane_dense_width(B, C)
    if lane_width is not None:
        reps = lane_width // C
        x_view = logits.reshape(B // reps, lane_width)           # metadata-only reshape
        prior_view = jnp.tile(prior_row, (1, reps))              # tiny (1, L) array
        out = _broadcast_add_2d(x_view, prior_view, out_dtype)
        return out.reshape(B, C)

    return _broadcast_add_2d(logits, prior_row, out_dtype)


if __name__ == "__main__":
    key = jax.random.PRNGKey(0)

    # --- Small shapes consistent with the module: batch=8, num_classes=32 ---
    B, C = 8, 32
    class_counts = jnp.arange(1, C + 1, dtype=jnp.float32)       # deterministic stand-in counts
    base_probs = class_counts / jnp.sum(class_counts)
    base_probs_log = jnp.log(base_probs)                         # the registered buffer

    logits = jax.random.normal(key, (B, C), dtype=jnp.float32)
    ref = logits + base_probs_log[None, :]

    out = jax.block_until_ready(logit_adjust(logits, base_probs_log, training=True))
    assert out.shape == (B, C) and out.dtype == jnp.float32
    assert jnp.allclose(out, ref, atol=1e-6), "mismatch vs reference (lane-dense path)"

    # Eval-mode forward is identity.
    out_eval = logit_adjust(logits, base_probs_log, training=False)
    assert jnp.allclose(out_eval, logits), "eval path must be identity"

    # --- Ragged batch tiles + class dim that is not a multiple of 128 (no padding pass) ---
    B2, C2 = 520, 300
    key2, key3 = jax.random.split(key)
    counts2 = jax.random.uniform(key2, (C2,), minval=1.0, maxval=100.0)
    prior2 = jnp.log(counts2 / jnp.sum(counts2))
    logits2 = jax.random.normal(key3, (B2, C2), dtype=jnp.float32)
    ref2 = logits2 + prior2[None, :]
    out2 = jax.block_until_ready(logit_adjust(logits2, prior2, training=True))
    assert jnp.allclose(out2, ref2, atol=1e-6), "mismatch vs reference (ragged batch tiles)"

    # --- Class axis wider than one tile (exercises class tiling + ragged class edge) ---
    B3, C3 = 40, 1300
    key4, key5 = jax.random.split(key3)
    counts3 = jax.random.uniform(key4, (C3,), minval=1.0, maxval=100.0)
    prior3 = jnp.log(counts3 / jnp.sum(counts3))
    logits3 = jax.random.normal(key5, (B3, C3), dtype=jnp.float32)
    ref3 = logits3 + prior3[None, :]
    out3 = jax.block_until_ready(logit_adjust(logits3, prior3, training=True))
    assert jnp.allclose(out3, ref3, atol=1e-6), "mismatch vs reference (tiled class axis)"

    # --- bf16 logits + f32 buffer: result promotes to f32 (PyTorch-style promotion) ---
    logits4 = jax.random.normal(key2, (16, C), dtype=jnp.bfloat16)
    ref4 = logits4.astype(jnp.float32) + base_probs_log[None, :]
    out4 = jax.block_until_ready(logit_adjust(logits4, base_probs_log, training=True))
    assert out4.dtype == jnp.float32
    assert jnp.allclose(out4, ref4, atol=1e-5), "mismatch vs reference (bf16 promotion)"

    print("KERNEL_OK")
</pallas_src>

<mosaic_0001>
module attributes {stable_mosaic.version = 11 : i64} {
  func.func @_logit_adjust_kernel(%arg0: i32, %arg1: i32, %arg2: memref<2x128xf32, #tpu.memory_space<vmem>>, %arg3: memref<1x128xf32, #tpu.memory_space<vmem>>, %arg4: memref<2x128xf32, #tpu.memory_space<vmem>>) attributes {dimension_semantics = [#tpu.dimension_semantics<parallel>, #tpu.dimension_semantics<parallel>], iteration_bounds = array<i64: 1, 1>, scalar_prefetch = 0 : i64, scratch_operands = 0 : i64, tpu.core_type = #tpu.core_type<tc>, window_params = [{transform_indices = @transform_0, window_bounds = array<i64: 2, 128>}, {transform_indices = @transform_1, window_bounds = array<i64: 1, 128>}, {transform_indices = @transform_2, window_bounds = array<i64: 2, 128>}]} {
    %c0 = arith.constant 0 : index
    %c0_0 = arith.constant 0 : index
    %0 = vector.load %arg2[%c0, %c0_0] : memref<2x128xf32, #tpu.memory_space<vmem>>, vector<2x128xf32>
    %c0_1 = arith.constant 0 : index
    %c0_2 = arith.constant 0 : index
    %1 = vector.load %arg3[%c0_1, %c0_2] : memref<1x128xf32, #tpu.memory_space<vmem>>, vector<1x128xf32>
    %2 = vector.broadcast %1 : vector<1x128xf32> to vector<2x128xf32>
    %3 = arith.addf %0, %2 : vector<2x128xf32>
    %c0_3 = arith.constant 0 : index
    %c0_4 = arith.constant 0 : index
    %4 = vector.load %arg4[%c0_3, %c0_4] : memref<2x128xf32, #tpu.memory_space<vmem>>, vector<2x128xf32>
    tpu.vector_store %arg4[%c0_3, %c0_4], %3 {strides = array<i32>} : memref<2x128xf32, #tpu.memory_space<vmem>>, vector<2x128xf32>,
    return
  }
  func.func @transform_0(%arg0: i32, %arg1: i32) -> (i32, i32) {
    %c0_i32 = arith.constant 0 : i32
    return %arg1, %arg0 : i32, i32
  }
  func.func @transform_1(%arg0: i32, %arg1: i32) -> (i32, i32) {
    %c0_i32 = arith.constant 0 : i32
    %c0_i32_0 = arith.constant 0 : i32
    return %c0_i32, %arg0 : i32, i32
  }
  func.func @transform_2(%arg0: i32, %arg1: i32) -> (i32, i32) {
    %c0_i32 = arith.constant 0 : i32
    return %arg1, %arg0 : i32, i32
  }
}

</mosaic_0001>

<bundles_post_ra>
// kernel: tpu_custom_call.1
= control target key start
LH: loop header
LB: loop body
LE: loop exit
PB: predicated region body
PF: predicated region fallthrough
CT: control target
= control target key end

     0   :  { %7 = vsyncpa [#allocation3], 0  ;;  %s144_s0 = inlined_call_operand.hbm [shape: f32[2,128], index: 0, kind: input, shape index: {}, may-alias: {0,2}]   ;;  %s145_s1 = inlined_call_operand.vmem [shape: f32[1,128], index: 1, kind: input, shape index: {}]   ;;  %s146_s2 = inlined_call_operand.hbm [shape: f32[2,128], index: 2, kind: output, shape index: {}, may-alias: {0,2}]  }
   0x1   :  { %8 = vsyncpa [#allocation4], 0  ;;  %s100_s9 = smov [#allocation2]   ;;  %s52_s13 = scalar_lea.hbm %s144_s0, 32 }
   0x2   :  { %s15_s10 = sshll.u32 %s100_s9, 4  ;;  %p53_p0 = scmp.ne.s32.totalorder %s144_s0, %s52_s13  ;;  %s16_s10 = int_to_ptr.vmem [resolvable:$true] %s15_s10 }
   0x3   :  { %p56_p1 = scmp.lt.u32.totalorder %s52_s13, %s144_s0 }
   0x5   :  { %p58_p2 = pnand %p56_p1, %p53_p0 }
   0x7   :  { %61 = shalt.err (!%p58_p2)
}
   0x8   :  { %s62_s18 = scalar_lea.vmem %s16_s10, 32  ;;  %p67_p4 = scmp.lt.s32.totalorder %s16_s10, %s16_s10 }
   0x9   :  { %p63_p3 = scmp.ne.s32.totalorder %s16_s10, %s62_s18  ;;  %p68_p5 = scmp.lt.s32.totalorder %s62_s18, %s62_s18 }
   0xb   :  { %p69_p6 = por %p68_p5, %p67_p4 }
   0xd   :  { %p70_p7 = pnand %p69_p6, %p63_p3 }
   0xf   :  { %73 = shalt.err (!%p70_p7)
}
  0x10   :  { %18 = dma.hbm_to_vmem [thread:$0]  %s144_s0, 32, %s16_s10, [#allocation3]  }
  0x11   :  { %96 = dma.done.wait [#allocation3], 32  }
  0x12   :  { %97 = vsyncadd [#allocation3], 4294967264  ;;  %s101_s21 = smov [#allocation5]   ;;  %v24_v0 = vld [vmem:[#allocation2] sm:$0x3] }
  0x13   :  { %s40_s22 = sshll.u32 %s101_s21, 4  ;;  %v49_v1 = vld [vmem:[%s145_s1] ss:$0 sm:$0xff]  ;;  %s41_s22 = int_to_ptr.vmem [resolvable:$true] %s40_s22 }
  0x14   :  { %v32_v2 = vadd.f32 %v49_v1, %v24_v0  ;;  %s74_s25 = scalar_lea.vmem %s41_s22, 32  ;;  %p79_p9 = scmp.lt.s32.totalorder %s41_s22, %s41_s22 }
  0x15   :  { %p75_p8 = scmp.ne.s32.totalorder %s41_s22, %s74_s25  ;;  %p80_p10 = scmp.lt.s32.totalorder %s74_s25, %s74_s25 }
  0x16   :  { %33 = vst [vmem:[#allocation5] sm:$0x3] %v32_v2 }
  0x17   :  { %p81_p11 = por %p80_p10, %p79_p9 }
  0x19   :  { %p82_p12 = pnand %p81_p11, %p75_p8 }
  0x1b   :  { %85 = shalt.err (!%p82_p12)
}
  0x1c   :  { %s86_s27 = scalar_lea.hbm %s146_s2, 32 }
  0x1d   :  { %p87_p13 = scmp.ne.s32.totalorder %s146_s2, %s86_s27  ;;  %p90_p0 = scmp.lt.u32.totalorder %s86_s27, %s146_s2 }
  0x1f   :  { %p92_p1 = pnand %p90_p0, %p87_p13 }
  0x21   :  { %95 = shalt.err (!%p92_p1)
}
  0x22   :  { %43 = dma.vmem_to_hbm [thread:$0]  %s41_s22, 32, %s146_s2, [#allocation4]  }
  0x23   :  { %98 = dma.done.wait [#allocation4], 32  }
  0x24   :  { %99 = vsyncadd [#allocation4], 4294967264 }
  0x25   :  { %47 = vsyncpa [#allocation3], 1 }
  0x26   :  { %48 = vsyncpa [#allocation4], 1 }

</bundles_post_ra>
